<compile_context>
chip_gen: v5e
topology: v5e:2x2
jax: 0.10.0
libtpu: 0.0.40
codegen_flags: <defaults>
</compile_context>

<pallas_src>
import functools

import jax
import jax.numpy as jnp
from jax.experimental import pallas as pl
from jax.experimental.pallas import tpu as pltpu

DEFAULT_MAX_TILE_ROWS = 8192            # D=64: 8192-row tile = 2 MiB -> HBM-roofline
_VMEM_TILE_BUDGET_BYTES = 12 * 1024 * 1024   # fits v5e's 16 MiB scoped default


def _num_tensorcores_per_chip():
    """Best-effort TensorCore count of the local device (2 on v7x-class, else 1)."""
    try:
        kind = jax.devices()[0].device_kind.lower()
    except Exception:
        return 1
    return 2 if "v7" in kind else 1


def _score_pool_kernel(nv_ref, *refs, pooling_mode, tile_n, steps_per_chunk,
                       has_chunks, has_bias):
    if has_bias:
        x_ref, w_ref, b_ref, o_ref, acc_ref = refs
    else:
        x_ref, w_ref, o_ref, acc_ref = refs
        b_ref = None

    if has_chunks:
        c = pl.program_id(0)              # chunk axis (one per TensorCore on v7x)
        k = pl.program_id(1)              # row-tile step inside the chunk
        n_steps = pl.num_programs(1)
    else:
        c = 0
        k = pl.program_id(0)
        n_steps = pl.num_programs(0)

    @pl.when(k == 0)
    def _():
        if pooling_mode == 'max':
            acc_ref[...] = jnp.full_like(acc_ref, -jnp.inf)
        else:
            acc_ref[...] = jnp.zeros_like(acc_ref)

    # Lane-dense scores on the MXU: contract D -> (P, TILE_N).
    s = jnp.einsum('pd,nd->pn', w_ref[...], x_ref[...],
                   preferred_element_type=jnp.float32)

    # In-kernel validity mask against the scalar-prefetched row count
    # (no host padding, no mask DMA stream, no recompile on the bag size).
    base = (c * steps_per_chunk + k) * tile_n
    lane = jax.lax.broadcasted_iota(jnp.int32, (1, tile_n), 1)
    valid = (base + lane) < nv_ref[0]

    if pooling_mode == 'max':
        # sigmoid + bias hoisted to finalization (sigmoid is monotone) -> no
        # EUP work and no bias stream in the hot loop.
        acc_ref[...] = jnp.maximum(acc_ref[...], jnp.where(valid, s, -jnp.inf))
    elif pooling_mode == 'ave':
        y = jax.nn.sigmoid(s + b_ref[...])
        acc_ref[...] = acc_ref[...] + jnp.where(valid, y, 0.0)
    elif pooling_mode == 'lse':
        y = jnp.exp(jax.nn.sigmoid(s + b_ref[...]))
        acc_ref[...] = acc_ref[...] + jnp.where(valid, y, 0.0)
    else:
        raise ValueError(pooling_mode)

    @pl.when(k == n_steps - 1)
    def _():
        if pooling_mode == 'max':
            red = jnp.max(acc_ref[...], axis=1, keepdims=True)   # (P, 1)
        else:
            red = jnp.sum(acc_ref[...], axis=1, keepdims=True)   # (P, 1)
        o_ref[...] = red[None, :, :]                              # (1, P, 1)


def _score_pool_call(x, weight, b_col, nv, pooling_mode, tile_cap,
                     num_chunks, core_parallel):
    N, D = x.shape
    P = weight.shape[0]
    has_bias = b_col is not None

    tile_n = N if N <= tile_cap else tile_cap
    n_tiles = -(-N // tile_n)

    if num_chunks > n_tiles:
        num_chunks = 1

    # Prefer a tile size whose tile count splits evenly across chunks (avoids
    # a fully-masked duplicate grid step from clamped block indices).
    if num_chunks > 1 and n_tiles % num_chunks != 0:
        target_tiles = n_tiles + (num_chunks - n_tiles % num_chunks)
        cand = ((-(-N // target_tiles)) + 7) // 8 * 8
        if cand >= 8 and (-(-N // cand)) % num_chunks == 0:
            tile_n = cand
            n_tiles = -(-N // tile_n)

    spc = -(-n_tiles // num_chunks)       # steps per chunk

    kernel = functools.partial(
        _score_pool_kernel, pooling_mode=pooling_mode, tile_n=tile_n,
        steps_per_chunk=spc, has_chunks=num_chunks > 1, has_bias=has_bias)

    if num_chunks > 1:
        if num_chunks * spc > n_tiles:
            # Uneven split fallback: clamp the (fully masked) trailing steps
            # onto the last real tile so every block index stays in bounds.
            x_index = lambda c, k, nv_ref: (jnp.minimum(c * spc + k, n_tiles - 1), 0)
        else:
            x_index = lambda c, k, nv_ref: (c * spc + k, 0)
        const_index = lambda c, k, nv_ref: (0, 0)
        out_index = lambda c, k, nv_ref: (c, 0, 0)
        grid = (num_chunks, spc)
        lead = getattr(pltpu, "CORE_PARALLEL", "parallel") if core_parallel else "parallel"
        semantics = (lead, "arbitrary")
    else:
        x_index = lambda k, nv_ref: (k, 0)
        const_index = lambda k, nv_ref: (0, 0)
        out_index = lambda k, nv_ref: (0, 0, 0)
        grid = (spc,)
        semantics = ("arbitrary",)

    in_specs = [
        pl.BlockSpec((tile_n, D), x_index),        # x row tile (streamed)
        pl.BlockSpec((P, D), const_index),         # weight (resident)
    ]
    args = [nv, x, weight]
    if has_bias:
        in_specs.append(pl.BlockSpec((P, 1), const_index))   # bias (ave/lse only)
        args.append(b_col)

    partials = pl.pallas_call(
        kernel,
        out_shape=jax.ShapeDtypeStruct((num_chunks, P, 1), jnp.float32),
        grid_spec=pltpu.PrefetchScalarGridSpec(
            num_scalar_prefetch=1,
            grid=grid,
            in_specs=in_specs,
            out_specs=pl.BlockSpec((1, P, 1), out_index),
            scratch_shapes=[pltpu.VMEM((P, tile_n), jnp.float32)],
        ),
        compiler_params=pltpu.CompilerParams(dimension_semantics=semantics),
    )(*args)

    return partials.reshape(num_chunks, P)


def score_pooling_forward(x, weight, bias, pooling_mode='max', net='minet',
                          max_tile_rows=DEFAULT_MAX_TILE_ROWS,
                          num_chunks=None, core_parallel=None):
    """x: (N, D) f32; weight: (P, D); bias: (P,) (PyTorch nn.Linear layout).

    Returns (output (1, P), emb=None), matching Score_pooling(net='minet').
    """
    # TODO(synk): net='MInet' path (pooling BEFORE the fc, emb = pooled x) not
    # implemented; the module's default config is net='minet'.
    assert net == 'minet'
    N, D = x.shape
    P, D2 = weight.shape
    assert D == D2 and N >= 1

    # Row-tile size: as large as possible (amortize ~0.35us per grid step; the
    # kernel is x-streaming / HBM-bound) while the double-buffered x tile plus
    # the (P, tile_n) accumulator stay inside v5e's 16 MiB scoped-VMEM default
    # (v6e/v7x scoped defaults are >= 32 MiB).
    per_row_bytes = 4 * (2 * D + P)
    vmem_cap_rows = max(8, (_VMEM_TILE_BUDGET_BYTES // per_row_bytes) // 8 * 8)
    tile_cap = max(8, (min(max_tile_rows, vmem_cap_rows) // 8) * 8)

    detected_cores = _num_tensorcores_per_chip()
    if num_chunks is None:
        num_chunks = detected_cores          # 1 on v5e/v6e, 2 on v7x
    if core_parallel is None:
        core_parallel = (num_chunks > 1) and (detected_cores > 1)

    b_col = None if pooling_mode == 'max' else bias.reshape(P, 1)
    nv = jnp.array([N], dtype=jnp.int32)     # scalar-prefetched valid-row count

    try:
        partials = _score_pool_call(x, weight, b_col, nv, pooling_mode,
                                    tile_cap, num_chunks, core_parallel)
    except Exception:
        if num_chunks <= 1:
            raise
        # Robust fallback to the single-chunk / single-TensorCore path.
        partials = _score_pool_call(x, weight, b_col, nv, pooling_mode,
                                    tile_cap, 1, False)

    if pooling_mode == 'max':
        out = jax.nn.sigmoid(jnp.max(partials, axis=0, keepdims=True)
                             + bias[None, :])
    elif pooling_mode == 'ave':
        out = jnp.sum(partials, axis=0, keepdims=True) / N
    elif pooling_mode == 'lse':
        out = jnp.log(jnp.sum(partials, axis=0, keepdims=True) / N)
    else:
        raise ValueError(pooling_mode)

    return out, None


def _reference(x, weight, bias, pooling_mode='max'):
    y = jax.nn.sigmoid(x @ weight.T + bias[None, :])
    if pooling_mode == 'max':
        return jnp.max(y, axis=0, keepdims=True)
    if pooling_mode == 'ave':
        return jnp.mean(y, axis=0, keepdims=True)
    return jnp.log(jnp.mean(jnp.exp(y), axis=0, keepdims=True))


if __name__ == "__main__":
    input_dim, output_dim = 64, 1

    key = jax.random.PRNGKey(0)
    kx, kw, kb = jax.random.split(key, 3)
    bound = 1.0 / (input_dim ** 0.5)   # nn.Linear-style uniform init
    weight = jax.random.uniform(kw, (output_dim, input_dim), jnp.float32, -bound, bound)
    bias = jax.random.uniform(kb, (output_dim,), jnp.float32, -bound, bound)

    # Config 1: default settings (big tile cap) -> single full-array tile,
    # chunking auto-detected from the device generation.
    N1 = 200
    x1 = jax.random.normal(kx, (N1, input_dim), dtype=jnp.float32)
    out1, emb1 = score_pooling_forward(x1, weight, bias, pooling_mode='max')
    out1 = jax.block_until_ready(out1)
    ref1 = _reference(x1, weight, bias, 'max')
    assert out1.shape == (1, output_dim)
    assert emb1 is None
    assert jnp.allclose(out1, ref1, atol=1e-5, rtol=1e-5), (out1, ref1)

    # Config 2: small tiles + forced 2-chunk split (exercises in-kernel masking,
    # the uneven-split clamp handling and the cross-chunk combine). CORE_PARALLEL
    # is only auto-enabled on multi-TensorCore chips, so this stays portable.
    out2, _ = score_pooling_forward(x1, weight, bias, pooling_mode='max',
                                    max_tile_rows=48, num_chunks=2,
                                    core_parallel=False)
    out2 = jax.block_until_ready(out2)
    assert jnp.allclose(out2, ref1, atol=1e-5, rtol=1e-5), (out2, ref1)

    # Config 3/4: 'ave' and 'lse' pooling modes (bias applied in-kernel),
    # multi-tile with a partial last tile.
    N3 = 40
    x3 = jax.random.normal(jax.random.PRNGKey(1), (N3, input_dim), dtype=jnp.float32)
    for mode in ('ave', 'lse'):
        out_m, _ = score_pooling_forward(x3, weight, bias, pooling_mode=mode,
                                         max_tile_rows=16)
        out_m = jax.block_until_ready(out_m)
        ref_m = _reference(x3, weight, bias, mode)
        assert jnp.allclose(out_m, ref_m, atol=1e-5, rtol=1e-5), (mode, out_m, ref_m)

    print("KERNEL_OK")
</pallas_src>

<mosaic_0001>
module attributes {stable_mosaic.version = 11 : i64} {
  func.func @_score_pool_kernel(%arg0: i32, %arg1: memref<1xi32, #tpu.memory_space<smem>>, %arg2: memref<200x64xf32, #tpu.memory_space<vmem>>, %arg3: memref<1x64xf32, #tpu.memory_space<vmem>>, %arg4: memref<1x1x1xf32, #tpu.memory_space<vmem>>, %arg5: memref<1x200xf32, #tpu.memory_space<vmem>>) attributes {dimension_semantics = [#tpu.dimension_semantics<arbitrary>], iteration_bounds = array<i64: 1>, scalar_prefetch = 1 : i64, scratch_operands = 1 : i64, tpu.core_type = #tpu.core_type<tc>, window_params = [{transform_indices = @transform_0, window_bounds = array<i64: 200, 64>}, {pipeline_mode = #tpu.pipeline_mode<synchronous>, transform_indices = @transform_1, window_bounds = array<i64: 1, 64>}, {pipeline_mode = #tpu.pipeline_mode<synchronous>, transform_indices = @transform_2, window_bounds = array<i64: 1, 1, 1>}]} {
    %c0_i32 = arith.constant 0 : i32
    %0 = arith.cmpi eq, %arg0, %c0_i32 : i32
    %1 = arith.extui %0 : i1 to i32
    %c0_i32_0 = arith.constant 0 : i32
    %2 = arith.cmpi ne, %1, %c0_i32_0 : i32
    scf.if %2 {
      %cst_13 = arith.constant 0xFF800000 : f32
      %22 = vector.broadcast %cst_13 : f32 to vector<1x200xf32>
      %c0_14 = arith.constant 0 : index
      %c0_15 = arith.constant 0 : index
      %23 = vector.load %arg5[%c0_14, %c0_15] : memref<1x200xf32, #tpu.memory_space<vmem>>, vector<1x200xf32>
      tpu.vector_store %arg5[%c0_14, %c0_15], %22 {strides = array<i32>} : memref<1x200xf32, #tpu.memory_space<vmem>>, vector<1x200xf32>,
    } else {
    }
    %c0 = arith.constant 0 : index
    %c0_1 = arith.constant 0 : index
    %3 = vector.load %arg3[%c0, %c0_1] : memref<1x64xf32, #tpu.memory_space<vmem>>, vector<1x64xf32>
    %c0_2 = arith.constant 0 : index
    %c0_3 = arith.constant 0 : index
    %4 = vector.load %arg2[%c0_2, %c0_3] : memref<200x64xf32, #tpu.memory_space<vmem>>, vector<200x64xf32>
    "tpu.trace_start"() <{level = 10 : i32, message = "pd,nd->pn"}> : () -> ()
    %cst = arith.constant dense<0.000000e+00> : vector<1x200xf32>
    %5 = tpu.matmul %3, %4, %cst {dimension_numbers = #tpu.dot_dimension_numbers<[1], [1], [0], [0], [0, 0, 1, 0], [], []>} : vector<1x64xf32>, vector<200x64xf32>, vector<1x200xf32> -> vector<1x200xf32>
    "tpu.trace_stop"() : () -> ()
    %c0_i32_4 = arith.constant 0 : i32
    %6 = arith.addi %c0_i32_4, %arg0 : i32
    %c200_i32 = arith.constant 200 : i32
    %7 = arith.muli %6, %c200_i32 : i32
    %8 = tpu.iota {dimensions = array<i32: 1>} : vector<1x200xi32>
    %9 = vector.broadcast %7 : i32 to vector<1x200xi32>
    %10 = arith.addi %9, %8 : vector<1x200xi32>
    %c0_5 = arith.constant 0 : index
    %11 = memref.load %arg1[%c0_5] : memref<1xi32, #tpu.memory_space<smem>>
    %12 = vector.broadcast %11 : i32 to vector<1x200xi32>
    %13 = arith.cmpi slt, %10, %12 : vector<1x200xi32>
    %c0_6 = arith.constant 0 : index
    %c0_7 = arith.constant 0 : index
    %14 = vector.load %arg5[%c0_6, %c0_7] : memref<1x200xf32, #tpu.memory_space<vmem>>, vector<1x200xf32>
    %cst_8 = arith.constant 0xFF800000 : f32
    %15 = vector.broadcast %cst_8 : f32 to vector<1x200xf32>
    %16 = arith.select %13, %5, %15 : vector<1x200xi1>, vector<1x200xf32>
    %17 = arith.maximumf %14, %16 : vector<1x200xf32>
    %c0_9 = arith.constant 0 : index
    %c0_10 = arith.constant 0 : index
    %18 = vector.load %arg5[%c0_9, %c0_10] : memref<1x200xf32, #tpu.memory_space<vmem>>, vector<1x200xf32>
    tpu.vector_store %arg5[%c0_9, %c0_10], %17 {strides = array<i32>} : memref<1x200xf32, #tpu.memory_space<vmem>>, vector<1x200xf32>,
    %c0_i32_11 = arith.constant 0 : i32
    %19 = arith.cmpi eq, %arg0, %c0_i32_11 : i32
    %20 = arith.extui %19 : i1 to i32
    %c0_i32_12 = arith.constant 0 : i32
    %21 = arith.cmpi ne, %20, %c0_i32_12 : i32
    scf.if %21 {
      %c0_13 = arith.constant 0 : index
      %c0_14 = arith.constant 0 : index
      %22 = vector.load %arg5[%c0_13, %c0_14] : memref<1x200xf32, #tpu.memory_space<vmem>>, vector<1x200xf32>
      %cst_15 = arith.constant dense<0xFF800000> : vector<1xf32>
      %23 = vector.multi_reduction <maximumf>, %22, %cst_15 [1] : vector<1x200xf32> to vector<1xf32>
      %24 = vector.shape_cast %23 : vector<1xf32> to vector<1x1xf32>
      %25 = vector.shape_cast %24 : vector<1x1xf32> to vector<1x1x1xf32>
      %c0_16 = arith.constant 0 : index
      %c0_17 = arith.constant 0 : index
      %c0_18 = arith.constant 0 : index
      %26 = vector.load %arg4[%c0_16, %c0_17, %c0_18] : memref<1x1x1xf32, #tpu.memory_space<vmem>>, vector<1x1x1xf32>
      tpu.vector_store %arg4[%c0_16, %c0_17, %c0_18], %25 {strides = array<i32>} : memref<1x1x1xf32, #tpu.memory_space<vmem>>, vector<1x1x1xf32>,
    } else {
    }
    return
  }
  func.func @transform_0(%arg0: i32, %arg1: memref<1xi32, #tpu.memory_space<smem>>) -> (i32, i32) {
    %c0_i32 = arith.constant 0 : i32
    %c0_i32_0 = arith.constant 0 : i32
    return %arg0, %c0_i32 : i32, i32
  }
  func.func @transform_1(%arg0: i32, %arg1: memref<1xi32, #tpu.memory_space<smem>>) -> (i32, i32) {
    %c0_i32 = arith.constant 0 : i32
    %c0_i32_0 = arith.constant 0 : i32
    %c0_i32_1 = arith.constant 0 : i32
    return %c0_i32, %c0_i32_0 : i32, i32
  }
  func.func @transform_2(%arg0: i32, %arg1: memref<1xi32, #tpu.memory_space<smem>>) -> (i32, i32, i32) {
    %c0_i32 = arith.constant 0 : i32
    %c0_i32_0 = arith.constant 0 : i32
    %c0_i32_1 = arith.constant 0 : i32
    %c0_i32_2 = arith.constant 0 : i32
    return %c0_i32, %c0_i32_0, %c0_i32_1 : i32, i32, i32
  }
}

</mosaic_0001>

<bundles_post_ra>
// kernel: tpu_custom_call.1
= control target key start
LH: loop header
LB: loop body
LE: loop exit
PB: predicated region body
PF: predicated region fallthrough
CT: control target
= control target key end

     0   :  { %vm49_vm0 = vcmask 523264   ;;  %s423_s0 = inlined_call_operand.<no memory space> [shape: s32[1], index: 0, kind: input, shape index: {}]   ;;  %s424_s1 = inlined_call_operand.vmem [shape: f32[200,64], index: 1, kind: input, shape index: {}]   ;;  %s425_s2 = inlined_call_operand.vmem [shape: f32[1,64], index: 2, kind: input, shape index: {}]   ;;  %s426_s3 = inlined_call_operand.hbm [shape: f32[1,1,1], index: 3, kind: output, shape index: {}]  }
   0x1   :  { %v39_v0 = vld [vmem:[%s424_s1 + $0x78] sm:$0xff]  ;;  %v38_v1 = vld [vmem:[%s424_s1 + $0x70] sm:$0xff]  ;;  %v48_v2 = vld [vmem:[%s424_s1 + $0xc0] sm:$0xff] }
   0x2   :  { %227 = vmatpush.xpose.msk.msra.mxu0 %vm49_vm0, %v39_v0  ;;  %244 = vmatpush.xpose.msk.msra.mxu1 %vm49_vm0, %v48_v2  ;;  %v47_v3 = vld [vmem:[%s424_s1 + $0xb8] sm:$0xff] }
   0x3   :  { %9 = vsyncpa [#allocation6], 0  ;;  %v37_v4 = vld [vmem:[%s424_s1 + $0x68] sm:$0xff]  ;;  %v46_v5 = vld [vmem:[%s424_s1 + $0xb0] sm:$0xff]  ;;  %v18_v18 = vlaneseq  ;;  %v282_v22 = vmov -inf   ;;  %v176_v31 = vstv %s423_s0  ;;  %vm185_vm4 = vcmask 1040384  }
   0x4   :  { %v36_v6 = vld [vmem:[%s424_s1 + $0x60] sm:$0xff]  ;;  %v45_v7 = vld [vmem:[%s424_s1 + $0xa8] sm:$0xff]  ;;  %v35_v8 = vld [vmem:[%s424_s1 + $0x58] sm:$0xff]  ;;  %vm204_vm5 = vcmask 581632   ;;  %s283_s0 = smov [#allocation5]   ;;  %s218_s13 = sshll.u32 %s426_s3, 4  ;;  %s219_s13 = int_to_ptr.hbm [resolvable:$true] %s218_s13 }
   0x5   :  { %v44_v9 = vld [vmem:[%s424_s1 + $0xa0] sm:$0xff]  ;;  %v34_v10 = vld [vmem:[%s424_s1 + $0x50] sm:$0xff]  ;;  %v43_v11 = vld [vmem:[%s424_s1 + $0x98] sm:$0xff]  ;;  %vm378_vm1 = vcmp.lt.s32.totalorder %v18_v18, 200  ;;  %v170_v29 = vand.u32 127, %v18_v18  ;;  %vm209_vm6 = vcmask 0  }
   0x6   :  { %228 = vmatpush.xpose.msk.msra.mxu0 %vm49_vm0, %v38_v1  ;;  %245 = vmatpush.xpose.msk.msra.mxu1 %vm49_vm0, %v47_v3  ;;  %v33_v12 = vld [vmem:[%s424_s1 + $0x48] sm:$0xff]  ;;  %v42_v13 = vld [vmem:[%s424_s1 + $0x90] sm:$0xff]  ;;  %v32_v14 = vld [vmem:[%s424_s1 + $0x40] sm:$0xff]  ;;  %22 = vst.msk [vmem:[#allocation2] sm:$0x3] %vm378_vm1, %v282_v22 }
   0x7   :  { %v41_v15 = vld [vmem:[%s424_s1 + $0x88] sm:$0xff]  ;;  %v31_v16 = vld [vmem:[%s424_s1 + $0x38] sm:$0xff]  ;;  %v40_v17 = vld [vmem:[%s424_s1 + $0x80] sm:$0xff]  ;;  %v171_v30 = vadd.s32 128, %v170_v29  ;;  %vm177_vm3 = vcmp.lt.s32.totalorder %v170_v29, %v176_v31 }
   0x8   :  { %v30_v19 = vld [vmem:[%s424_s1 + $0x30] sm:$0xff]  ;;  %v23_v21 = vld [vmem:[%s425_s2] sm:$0x1]  ;;  %v29_v23 = vld [vmem:[%s424_s1 + $0x28] sm:$0xff] }
   0x9   :  { %v28_v24 = vld [vmem:[%s424_s1 + $0x20] sm:$0xff]  ;;  %v27_v25 = vld [vmem:[%s424_s1 + $0x18] sm:$0xff]  ;;  %v26_v26 = vld [vmem:[%s424_s1 + $0x10] sm:$0xff]  ;;  %vm178_vm2 = vcmp.lt.s32.totalorder %v171_v30, %v176_v31 }
   0xa   :  { %229 = vmatpush.xpose.msk.msra.mxu0 %vm49_vm0, %v37_v4  ;;  %246 = vmatpush.xpose.msk.msra.mxu1 %vm49_vm0, %v46_v5  ;;  %v25_v27 = vld [vmem:[%s424_s1 + $0x8] sm:$0xff]  ;;  %v24_v28 = vld [vmem:[%s424_s1] sm:$0xff]  ;;  %s216_s1 = sshll.u32 %s283_s0, 4  ;;  %s217_s1 = int_to_ptr.vmem [resolvable:$true] %s216_s1 }
   0xd   :  { %v179_v36 = vld [vmem:[#allocation2] sm:$0x3] }
   0xe   :  { %230 = vmatpush.xpose.msk.msra.mxu0 %vm49_vm0, %v36_v6  ;;  %247 = vmatpush.xpose.msk.msra.mxu1 %vm49_vm0, %v45_v7 }
  0x12   :  { %231 = vmatpush.xpose.msk.msra.mxu0 %vm49_vm0, %v35_v8  ;;  %248 = vmatpush.xpose.msk.msra.mxu1 %vm49_vm0, %v44_v9 }
  0x16   :  { %232 = vmatpush.xpose.msk.msra.mxu0 %vm49_vm0, %v34_v10  ;;  %249 = vmatpush.xpose.msk.msra.mxu1 %vm49_vm0, %v43_v11 }
  0x1a   :  { %233 = vmatpush.xpose.msk.msra.mxu0 %vm49_vm0, %v33_v12  ;;  %250 = vmatpush.xpose.msk.msra.mxu1 %vm49_vm0, %v42_v13 }
  0x1e   :  { %234 = vmatpush.xpose.msk.msra.mxu0 %vm49_vm0, %v32_v14  ;;  %251 = vmatpush.xpose.msk.msra.mxu1 %vm49_vm0, %v41_v15 }
  0x22   :  { %235 = vmatpush.xpose.msk.msra.mxu0 %vm49_vm0, %v31_v16  ;;  %252 = vmatpush.xpose.msk.msra.mxu1 %vm49_vm0, %v40_v17 }
  0x25   :  { %253 = vmatmul.msk.f32.vlgmr.msra.gmra.mxu1 %vm49_vm0, %v23_v21 }
  0x26   :  { %236 = vmatpush.xpose.msk.msra.mxu0 %vm49_vm0, %v30_v19 }
  0x2a   :  { %237 = vmatpush.xpose.msk.msra.mxu0 %vm49_vm0, %v29_v23 }
  0x2e   :  { %238 = vmatpush.xpose.msk.msra.mxu0 %vm49_vm0, %v28_v24 }
  0x32   :  { %239 = vmatpush.xpose.msk.msra.mxu0 %vm49_vm0, %v27_v25 }
  0x36   :  { %240 = vmatpush.xpose.msk.msra.mxu0 %vm49_vm0, %v26_v26 }
  0x3a   :  { %241 = vmatpush.xpose.msk.msra.mxu0 %vm49_vm0, %v25_v27 }
  0x3e   :  { %242 = vmatpush.xpose.msk.msra.mxu0 %vm49_vm0, %v24_v28 }
  0x41   :  { %243 = vmatmul.msk.f32.vlgmr.msra.gmra.mxu0 %vm49_vm0, %v23_v21 }
  0xa2   :  { %v165_v32 = vpop.f32.mrf.mxu1 }
  0xa3   :  { %v181_v33 = vsel %vm178_vm2, %v165_v32, -inf }
  0xa4   :  { %v184_v34 = vrot.slane %v181_v33, 7 }
  0xbe   :  { %v145_v35 = vpop.f32.mrf.mxu0 }
  0xbf   :  { %v180_v37 = vsel %vm177_vm3, %v145_v35, -inf }
  0xc0   :  { %v186_v38 = vsel %vm185_vm4, %v180_v37, %v184_v34 }
  0xc1   :  { %v188_v39 = vmax.f32 %v179_v36, %v186_v38 }
  0xc3   :  { %193 = vst.msk [vmem:[#allocation2] sm:$0x3] %vm378_vm1, %v188_v39 }
  0xca   :  { %v197_v40 = vld [vmem:[#allocation2] sm:$0x3] }
  0xcb   :  { %v199_v41 = vperm.slane %v197_v40, 0  ;;  %v200_v42 = vperm.slane %v197_v40, 1 }
  0xcd   :  { %v203_v43 = vsel %vm185_vm4, %v199_v41, -inf  ;;  %v205_v44 = vsel %vm204_vm5, %v200_v42, -inf }
  0xce   :  { %v206_v45 = vmax.f32 %v203_v43, %v205_v44 }
  0xd0   :  { %207 = vmax.xlane.f32.xlu0 %v206_v45 }
 0x143   :  { %v208_v46 = vpop.xlane.xlu0 %207 }
 0x144   :  { %210 = vst.msk [vmem:[#allocation5] sm:$0x1] %vm209_vm6, %v208_v46 }
 0x145   :  { %221 = dma.vmem_to_hbm [thread:$0]  %s217_s1, 16, %s219_s13, [#allocation6]  }
 0x146   :  { %280 = dma.done.wait [#allocation6], 16  }
 0x147   :  { %281 = vsyncadd [#allocation6], 4294967280 }
 0x148   :  { %226 = vsyncpa [#allocation6], 1 }

</bundles_post_ra>
